<compile_context>
chip_gen: v5e
topology: v5e:2x2
jax: 0.10.0
libtpu: 0.0.40
codegen_flags: <defaults>
</compile_context>

<pallas_src>
import functools

import jax
import jax.numpy as jnp
import numpy as np
from jax.experimental import pallas as pl
from jax.experimental.pallas import tpu as pltpu


_LANES = 128
_ACC_ROWS = 8                           # f32 sublane granule; accumulator rows
_TARGET_TILE_BYTES = 8 * 1024 * 1024    # per-step logits block target (>> 0.35us step overhead)
_VMEM_HEADROOM = 8 * 1024 * 1024        # slack for compiler temporaries / scratch / spills


def _vmem_limit_bytes():
    """Generation-aware VMEM limit: ~70% of physical, capped at 100 MiB."""
    cap = 64 * 1024 * 1024              # conservative fallback (v7x physical VMEM)
    try:
        info = pltpu.get_tpu_info()
        cap = int(getattr(info, "vmem_capacity_bytes", cap) or cap)
    except Exception:
        pass
    return min(int(cap * 0.7), 100 * 1024 * 1024)


def _rows_per_chunk(x_itemsize, n_classes):
    """Sublane rows per vreg-resident chunk of the in-kernel loop."""
    if n_classes > 8:
        return 8                                     # bound register pressure for large C
    return min(16, max(8, 32 // max(1, x_itemsize)))  # 8 for f32, 16 for bf16/f16


def _choose_s_tile(S, n_classes, x_itemsize, vmem_budget):
    """Rows (of 128 lanes) per grid step.  Honest accounting: double-buffered
    logits + int8 labels per row, capped by a per-step logits-size target."""
    per_row_stream = 2 * _LANES * (n_classes * x_itemsize + 1)   # 2x: double buffering
    rows_budget = max(32, vmem_budget // per_row_stream)
    rows_target = max(32, _TARGET_TILE_BYTES // (n_classes * _LANES * x_itemsize))
    rows = min(rows_budget, rows_target)
    if rows >= S:
        return S
    return max(32, (rows // 32) * 32)   # multiple of 32: int8/bf16 sublane tiling + chunking


def _fold_rows(v, rows):
    """(C, r, 128) -> (C, rows, 128) via VPU-only halving adds (r = pow2 multiple of rows)."""
    while v.shape[1] > rows:
        half = v.shape[1] // 2
        v = v[:, :half, :] + v[:, half:, :]
    return v


def _soft_dice_kernel(x_ref, t_ref, o_ref, acc_i_ref, acc_u_ref, *,
                      smooth, n_classes, n_total, s_tile, rows_per_chunk,
                      has_tail, unroll):
    """grid = (B, S_tiles).  Blocks (batch dim squeezed):
         x_ref: (C, s_tile, 128) logits (native dtype)
         t_ref: (1, s_tile, 128) int8 labels
         o_ref: (C, 1) f32 per-(b, c) dice, written on the last S tile
       Scratch: acc_i_ref / acc_u_ref (C, 8, 128) f32 running sums."""
    n = pl.program_id(1)
    n_last = pl.num_programs(1) - 1
    num_chunks = s_tile // rows_per_chunk

    @pl.when(n == 0)
    def _init():
        acc_i_ref[...] = jnp.zeros_like(acc_i_ref)
        acc_u_ref[...] = jnp.zeros_like(acc_u_ref)

    def _accumulate(masked):
        # Loop-invariant iotas hoisted out of the chunk loop (JAX does not CSE them).
        cls = jax.lax.broadcasted_iota(jnp.int32, (n_classes, rows_per_chunk, _LANES), 0)
        if masked:
            row = jax.lax.broadcasted_iota(jnp.int32, (1, rows_per_chunk, _LANES), 1)
            lane = jax.lax.broadcasted_iota(jnp.int32, (1, rows_per_chunk, _LANES), 2)
            pix_in_chunk = row * _LANES + lane           # (1, rpc, 128)
            tile_base = n * s_tile * _LANES

        def body(i, carry):
            acc_i, acc_u = carry
            r0 = pl.multiple_of(i * rows_per_chunk, rows_per_chunk)
            x = x_ref[:, pl.ds(r0, rows_per_chunk), :].astype(jnp.float32)   # (C, rpc, 128)
            lbl = t_ref[:, pl.ds(r0, rows_per_chunk), :].astype(jnp.int32)   # (1, rpc, 128)

            # Per-pixel softmax; class axis is MAJOR -> cross-vreg VPU max/adds only.
            m = jnp.max(x, axis=0, keepdims=True)
            e = jnp.exp(x - m)
            denom = jnp.sum(e, axis=0, keepdims=True)
            r = pl.reciprocal(denom, approx=True)        # EUP slot
            r = r * (2.0 - denom * r)                    # one Newton step (VPU) -> ~exact f32
            p = e * r                                    # (C, rpc, 128)

            hit = lbl == cls                             # one-hot as a compare mask
            if masked:
                valid = (tile_base + r0 * _LANES + pix_in_chunk) < n_total
                hit = hit & valid
                # Select-based masking (NOT multiplicative): padded/garbage lanes may be NaN.
                p_u = jnp.where(valid, p, 0.0)
            else:
                p_u = p
            chunk_i = jnp.where(hit, p, 0.0)             # p * onehot
            chunk_u = p_u + jnp.where(hit, 1.0, 0.0)     # p + onehot
            acc_i = acc_i + _fold_rows(chunk_i, acc_i.shape[1])
            acc_u = acc_u + _fold_rows(chunk_u, acc_u.shape[1])
            return acc_i, acc_u

        init = (acc_i_ref[...], acc_u_ref[...])
        acc_i, acc_u = jax.lax.fori_loop(0, num_chunks, body, init, unroll=unroll)
        acc_i_ref[...] = acc_i
        acc_u_ref[...] = acc_u

    if has_tail:
        # Pay the tail mask only on the last spatial tile.
        @pl.when(n != n_last)
        def _steady():
            _accumulate(masked=False)

        @pl.when(n == n_last)
        def _tail():
            _accumulate(masked=True)
    else:
        _accumulate(masked=False)

    @pl.when(n == n_last)
    def _finalize():
        inter = jnp.sum(acc_i_ref[...], axis=1)                       # (C, 128)
        inter = jnp.sum(inter, axis=-1, keepdims=True) + smooth       # (C, 1)
        union = jnp.sum(acc_u_ref[...], axis=1)
        union = jnp.sum(union, axis=-1, keepdims=True) + smooth       # (C, 1)
        o_ref[...] = 2.0 * inter / union                              # (C, 1)


def soft_dice_loss(logits, target, n_classes, smooth=0.01):
    """logits: (B, C, H, W) float (f32 or bf16); target: (B, 1, H, W) integer labels.
    Matches SoftDiceLoss.forward: 1 - sum_{b,c} 2*(inter+s)/(union+s) / (B*C)."""
    B, C = logits.shape[0], logits.shape[1]
    assert C == n_classes

    x = logits.reshape(B, C, -1)                       # native dtype stays in HBM
    N = x.shape[-1]
    t = target.reshape(B, 1, -1).astype(jnp.int32)

    x_itemsize = x.dtype.itemsize
    rpc = _rows_per_chunk(x_itemsize, C)
    granule = rpc * _LANES
    N_pad = granule * pl.cdiv(N, granule)
    if N_pad != N:                                     # padded pixels are masked in-kernel
        x = jnp.pad(x, ((0, 0), (0, 0), (0, N_pad - N)))
        t = jnp.pad(t, ((0, 0), (0, 0), (0, N_pad - N)))
    S = N_pad // _LANES

    # Spatial -> sublane axis: all 8 sublanes carry data even for small C.
    t_dtype = jnp.int8 if n_classes <= 127 else jnp.int32
    x4 = x.reshape(B, C, S, _LANES)
    t4 = t.reshape(B, 1, S, _LANES).astype(t_dtype)

    vmem_limit = _vmem_limit_bytes()
    s_tile = _choose_s_tile(S, C, x_itemsize, vmem_limit - _VMEM_HEADROOM)
    grid_n = pl.cdiv(S, s_tile)
    has_tail = (grid_n * s_tile * _LANES) != N
    num_chunks = s_tile // rpc

    kernel = functools.partial(
        _soft_dice_kernel,
        smooth=float(smooth),
        n_classes=C,
        n_total=N,
        s_tile=s_tile,
        rows_per_chunk=rpc,
        has_tail=has_tail,
        unroll=max(1, min(8, num_chunks)),
    )

    cost = pl.CostEstimate(
        flops=int(10 * B * C * N_pad),
        transcendentals=int(B * C * N_pad),
        bytes_accessed=int(B * N_pad * (C * x_itemsize + t4.dtype.itemsize) + B * C * 4),
    )

    partial_dice = pl.pallas_call(
        kernel,
        out_shape=jax.ShapeDtypeStruct((B, C, 1), jnp.float32),
        grid_spec=pltpu.PrefetchScalarGridSpec(
            num_scalar_prefetch=0,
            grid=(B, grid_n),
            in_specs=[
                pl.BlockSpec((None, C, s_tile, _LANES), lambda b, n: (b, 0, n, 0)),
                pl.BlockSpec((None, 1, s_tile, _LANES), lambda b, n: (b, 0, n, 0)),
            ],
            out_specs=pl.BlockSpec((None, C, 1), lambda b, n: (b, 0, 0)),
            scratch_shapes=[
                pltpu.VMEM((C, _ACC_ROWS, _LANES), jnp.float32),   # running sum(p * onehot)
                pltpu.VMEM((C, _ACC_ROWS, _LANES), jnp.float32),   # running sum(p + onehot)
            ],
        ),
        compiler_params=pltpu.CompilerParams(
            dimension_semantics=(pltpu.PARALLEL, pltpu.ARBITRARY),
            vmem_limit_bytes=vmem_limit,
        ),
        cost_estimate=cost,
    )(x4, t4)

    dice = partial_dice[:, :, 0]                       # (B, C)
    return 1.0 - jnp.sum(dice) / (float(B) * float(C))


def _reference_soft_dice_loss(logits, target, n_classes, smooth=0.01):
    B, C = logits.shape[0], logits.shape[1]
    p = jax.nn.softmax(logits.astype(jnp.float32), axis=1).reshape(B, C, -1)
    lbl = target.reshape(B, -1).astype(jnp.int32)
    onehot = jnp.transpose(jax.nn.one_hot(lbl, C, dtype=jnp.float32), (0, 2, 1))
    inter = jnp.sum(p * onehot, axis=2) + smooth
    union = jnp.sum(p, axis=2) + jnp.sum(onehot, axis=2) + smooth
    score = jnp.sum(2.0 * inter / union)
    return 1.0 - score / (float(B) * float(C))


if __name__ == "__main__":
    n_classes = 4
    B, H, W = 2, 16, 16

    key = jax.random.PRNGKey(0)
    k_logits, k_target = jax.random.split(key)
    logits = jax.random.normal(k_logits, (B, n_classes, H, W), dtype=jnp.float32)
    target = jax.random.randint(k_target, (B, 1, H, W), 0, n_classes, dtype=jnp.int32)

    # f32 logits path
    loss = jax.block_until_ready(soft_dice_loss(logits, target, n_classes))
    ref = _reference_soft_dice_loss(logits, target, n_classes)
    np.testing.assert_allclose(np.asarray(loss), np.asarray(ref), rtol=1e-4, atol=1e-4)

    # bf16 logits path (halves the dominant HBM traffic; compute stays f32 in-kernel)
    logits_bf16 = logits.astype(jnp.bfloat16)
    loss_bf16 = jax.block_until_ready(soft_dice_loss(logits_bf16, target, n_classes))
    ref_bf16 = _reference_soft_dice_loss(logits_bf16.astype(jnp.float32), target, n_classes)
    np.testing.assert_allclose(np.asarray(loss_bf16), np.asarray(ref_bf16),
                               rtol=1e-4, atol=1e-4)

    print("KERNEL_OK")
</pallas_src>

<mosaic_0001>
module attributes {stable_mosaic.version = 11 : i64} {
  func.func @_soft_dice_kernel(%arg0: i32, %arg1: i32, %arg2: memref<1x4x8x128xf32, #tpu.memory_space<vmem>>, %arg3: memref<1x1x8x128xi8, #tpu.memory_space<vmem>>, %arg4: memref<1x4x1xf32, #tpu.memory_space<vmem>>, %arg5: memref<4x8x128xf32, #tpu.memory_space<vmem>>, %arg6: memref<4x8x128xf32, #tpu.memory_space<vmem>>) attributes {dimension_semantics = [#tpu.dimension_semantics<parallel>, #tpu.dimension_semantics<arbitrary>], iteration_bounds = array<i64: 2, 1>, scalar_prefetch = 0 : i64, scratch_operands = 2 : i64, tpu.core_type = #tpu.core_type<tc>, window_params = [{transform_indices = @transform_0, window_bounds = array<i64: 1, 4, 8, 128>}, {transform_indices = @transform_1, window_bounds = array<i64: 1, 1, 8, 128>}, {transform_indices = @transform_2, window_bounds = array<i64: 1, 4, 1>}]} {
    %c0_i32 = arith.constant 0 : i32
    %0 = arith.cmpi eq, %arg1, %c0_i32 : i32
    %1 = arith.extui %0 : i1 to i32
    %c0_i32_0 = arith.constant 0 : i32
    %2 = arith.cmpi ne, %1, %c0_i32_0 : i32
    scf.if %2 {
      %cst = arith.constant 0.000000e+00 : f32
      %12 = vector.broadcast %cst : f32 to vector<4x8x128xf32>
      %c0 = arith.constant 0 : index
      %c0_7 = arith.constant 0 : index
      %c0_8 = arith.constant 0 : index
      %13 = vector.load %arg5[%c0, %c0_7, %c0_8] : memref<4x8x128xf32, #tpu.memory_space<vmem>>, vector<4x8x128xf32>
      tpu.vector_store %arg5[%c0, %c0_7, %c0_8], %12 {strides = array<i32>} : memref<4x8x128xf32, #tpu.memory_space<vmem>>, vector<4x8x128xf32>,
      %cst_9 = arith.constant 0.000000e+00 : f32
      %14 = vector.broadcast %cst_9 : f32 to vector<4x8x128xf32>
      %c0_10 = arith.constant 0 : index
      %c0_11 = arith.constant 0 : index
      %c0_12 = arith.constant 0 : index
      %15 = vector.load %arg6[%c0_10, %c0_11, %c0_12] : memref<4x8x128xf32, #tpu.memory_space<vmem>>, vector<4x8x128xf32>
      tpu.vector_store %arg6[%c0_10, %c0_11, %c0_12], %14 {strides = array<i32>} : memref<4x8x128xf32, #tpu.memory_space<vmem>>, vector<4x8x128xf32>,
    } else {
    }
    %c0_i32_1 = arith.constant 0 : i32
    %3 = arith.cmpi ne, %arg1, %c0_i32_1 : i32
    %4 = arith.extui %3 : i1 to i32
    %c0_i32_2 = arith.constant 0 : i32
    %5 = arith.cmpi ne, %4, %c0_i32_2 : i32
    scf.if %5 {
      %12 = tpu.iota {dimensions = array<i32: 0>} : vector<4x8x128xi32>
      %c0 = arith.constant 0 : index
      %c0_7 = arith.constant 0 : index
      %c0_8 = arith.constant 0 : index
      %13 = vector.load %arg5[%c0, %c0_7, %c0_8] : memref<4x8x128xf32, #tpu.memory_space<vmem>>, vector<4x8x128xf32>
      %c0_9 = arith.constant 0 : index
      %c0_10 = arith.constant 0 : index
      %c0_11 = arith.constant 0 : index
      %14 = vector.load %arg6[%c0_9, %c0_10, %c0_11] : memref<4x8x128xf32, #tpu.memory_space<vmem>>, vector<4x8x128xf32>
      %c0_i32_12 = arith.constant 0 : i32
      %c8_i32 = arith.constant 8 : i32
      %15 = arith.muli %c0_i32_12, %c8_i32 : i32
      %16 = tpu.assume_multiple %15, 8 : i32
      %c0_13 = arith.constant 0 : index
      %c0_14 = arith.constant 0 : index
      %17 = arith.index_cast %16 : i32 to index
      %c0_15 = arith.constant 0 : index
      %18 = vector.load %arg2[%c0_13, %c0_14, %17, %c0_15] : memref<1x4x8x128xf32, #tpu.memory_space<vmem>>, vector<1x4x8x128xf32>
      %19 = vector.shape_cast %18 : vector<1x4x8x128xf32> to vector<4x8x128xf32>
      %c0_16 = arith.constant 0 : index
      %c0_17 = arith.constant 0 : index
      %20 = arith.index_cast %16 : i32 to index
      %c0_18 = arith.constant 0 : index
      %21 = vector.load %arg3[%c0_16, %c0_17, %20, %c0_18] : memref<1x1x8x128xi8, #tpu.memory_space<vmem>>, vector<1x1x8x128xi8>
      %22 = vector.shape_cast %21 : vector<1x1x8x128xi8> to vector<1x8x128xi8>
      %23 = arith.extsi %22 : vector<1x8x128xi8> to vector<1x8x128xi32>
      %cst = arith.constant dense<0xFF800000> : vector<8x128xf32>
      %24 = vector.multi_reduction <maximumf>, %19, %cst [0] : vector<4x8x128xf32> to vector<8x128xf32>
      %25 = vector.shape_cast %24 : vector<8x128xf32> to vector<1x8x128xf32>
      %26 = vector.broadcast %25 : vector<1x8x128xf32> to vector<4x8x128xf32>
      %27 = arith.subf %19, %26 : vector<4x8x128xf32>
      %28 = math.exp %27 : vector<4x8x128xf32>
      %cst_19 = arith.constant dense<0.000000e+00> : vector<8x128xf32>
      %29 = vector.multi_reduction <add>, %28, %cst_19 [0] : vector<4x8x128xf32> to vector<8x128xf32>
      %30 = vector.shape_cast %29 : vector<8x128xf32> to vector<1x8x128xf32>
      %31 = tpu.reciprocal %30 {approx = true} : vector<1x8x128xf32> -> vector<1x8x128xf32>
      %32 = arith.mulf %30, %31 : vector<1x8x128xf32>
      %cst_20 = arith.constant 2.000000e+00 : f32
      %33 = vector.broadcast %cst_20 : f32 to vector<1x8x128xf32>
      %34 = arith.subf %33, %32 : vector<1x8x128xf32>
      %35 = arith.mulf %31, %34 : vector<1x8x128xf32>
      %36 = vector.broadcast %35 : vector<1x8x128xf32> to vector<4x8x128xf32>
      %37 = arith.mulf %28, %36 : vector<4x8x128xf32>
      %38 = vector.broadcast %23 : vector<1x8x128xi32> to vector<4x8x128xi32>
      %39 = arith.cmpi eq, %38, %12 : vector<4x8x128xi32>
      %cst_21 = arith.constant 0.000000e+00 : f32
      %40 = vector.broadcast %cst_21 : f32 to vector<4x8x128xf32>
      %41 = arith.select %39, %37, %40 : vector<4x8x128xi1>, vector<4x8x128xf32>
      %cst_22 = arith.constant 1.000000e+00 : f32
      %cst_23 = arith.constant 0.000000e+00 : f32
      %42 = vector.broadcast %cst_22 : f32 to vector<4x8x128xf32>
      %43 = vector.broadcast %cst_23 : f32 to vector<4x8x128xf32>
      %44 = arith.select %39, %42, %43 : vector<4x8x128xi1>, vector<4x8x128xf32>
      %45 = arith.addf %37, %44 : vector<4x8x128xf32>
      %46 = arith.addf %13, %41 : vector<4x8x128xf32>
      %47 = arith.addf %14, %45 : vector<4x8x128xf32>
      %c1_i32 = arith.constant 1 : i32
      %c0_24 = arith.constant 0 : index
      %c0_25 = arith.constant 0 : index
      %c0_26 = arith.constant 0 : index
      %48 = vector.load %arg5[%c0_24, %c0_25, %c0_26] : memref<4x8x128xf32, #tpu.memory_space<vmem>>, vector<4x8x128xf32>
      tpu.vector_store %arg5[%c0_24, %c0_25, %c0_26], %46 {strides = array<i32>} : memref<4x8x128xf32, #tpu.memory_space<vmem>>, vector<4x8x128xf32>,
      %c0_27 = arith.constant 0 : index
      %c0_28 = arith.constant 0 : index
      %c0_29 = arith.constant 0 : index
      %49 = vector.load %arg6[%c0_27, %c0_28, %c0_29] : memref<4x8x128xf32, #tpu.memory_space<vmem>>, vector<4x8x128xf32>
      tpu.vector_store %arg6[%c0_27, %c0_28, %c0_29], %47 {strides = array<i32>} : memref<4x8x128xf32, #tpu.memory_space<vmem>>, vector<4x8x128xf32>,
    } else {
    }
    %c0_i32_3 = arith.constant 0 : i32
    %6 = arith.cmpi eq, %arg1, %c0_i32_3 : i32
    %7 = arith.extui %6 : i1 to i32
    %c0_i32_4 = arith.constant 0 : i32
    %8 = arith.cmpi ne, %7, %c0_i32_4 : i32
    scf.if %8 {
      %12 = tpu.iota {dimensions = array<i32: 0>} : vector<4x8x128xi32>
      %13 = tpu.iota {dimensions = array<i32: 1>} : vector<1x8x128xi32>
      %14 = tpu.iota {dimensions = array<i32: 2>} : vector<1x8x128xi32>
      %c128_i32 = arith.constant 128 : i32
      %15 = vector.broadcast %c128_i32 : i32 to vector<1x8x128xi32>
      %16 = arith.muli %13, %15 : vector<1x8x128xi32>
      %17 = arith.addi %16, %14 : vector<1x8x128xi32>
      %c8_i32 = arith.constant 8 : i32
      %18 = arith.muli %arg1, %c8_i32 : i32
      %c128_i32_7 = arith.constant 128 : i32
      %19 = arith.muli %18, %c128_i32_7 : i32
      %c0 = arith.constant 0 : index
      %c0_8 = arith.constant 0 : index
      %c0_9 = arith.constant 0 : index
      %20 = vector.load %arg5[%c0, %c0_8, %c0_9] : memref<4x8x128xf32, #tpu.memory_space<vmem>>, vector<4x8x128xf32>
      %c0_10 = arith.constant 0 : index
      %c0_11 = arith.constant 0 : index
      %c0_12 = arith.constant 0 : index
      %21 = vector.load %arg6[%c0_10, %c0_11, %c0_12] : memref<4x8x128xf32, #tpu.memory_space<vmem>>, vector<4x8x128xf32>
      %c0_i32_13 = arith.constant 0 : i32
      %c8_i32_14 = arith.constant 8 : i32
      %22 = arith.muli %c0_i32_13, %c8_i32_14 : i32
      %23 = tpu.assume_multiple %22, 8 : i32
      %c0_15 = arith.constant 0 : index
      %c0_16 = arith.constant 0 : index
      %24 = arith.index_cast %23 : i32 to index
      %c0_17 = arith.constant 0 : index
      %25 = vector.load %arg2[%c0_15, %c0_16, %24, %c0_17] : memref<1x4x8x128xf32, #tpu.memory_space<vmem>>, vector<1x4x8x128xf32>
      %26 = vector.shape_cast %25 : vector<1x4x8x128xf32> to vector<4x8x128xf32>
      %c0_18 = arith.constant 0 : index
      %c0_19 = arith.constant 0 : index
      %27 = arith.index_cast %23 : i32 to index
      %c0_20 = arith.constant 0 : index
      %28 = vector.load %arg3[%c0_18, %c0_19, %27, %c0_20] : memref<1x1x8x128xi8, #tpu.memory_space<vmem>>, vector<1x1x8x128xi8>
      %29 = vector.shape_cast %28 : vector<1x1x8x128xi8> to vector<1x8x128xi8>
      %30 = arith.extsi %29 : vector<1x8x128xi8> to vector<1x8x128xi32>
      %cst = arith.constant dense<0xFF800000> : vector<8x128xf32>
      %31 = vector.multi_reduction <maximumf>, %26, %cst [0] : vector<4x8x128xf32> to vector<8x128xf32>
      %32 = vector.shape_cast %31 : vector<8x128xf32> to vector<1x8x128xf32>
      %33 = vector.broadcast %32 : vector<1x8x128xf32> to vector<4x8x128xf32>
      %34 = arith.subf %26, %33 : vector<4x8x128xf32>
      %35 = math.exp %34 : vector<4x8x128xf32>
      %cst_21 = arith.constant dense<0.000000e+00> : vector<8x128xf32>
      %36 = vector.multi_reduction <add>, %35, %cst_21 [0] : vector<4x8x128xf32> to vector<8x128xf32>
      %37 = vector.shape_cast %36 : vector<8x128xf32> to vector<1x8x128xf32>
      %38 = tpu.reciprocal %37 {approx = true} : vector<1x8x128xf32> -> vector<1x8x128xf32>
      %39 = arith.mulf %37, %38 : vector<1x8x128xf32>
      %cst_22 = arith.constant 2.000000e+00 : f32
      %40 = vector.broadcast %cst_22 : f32 to vector<1x8x128xf32>
      %41 = arith.subf %40, %39 : vector<1x8x128xf32>
      %42 = arith.mulf %38, %41 : vector<1x8x128xf32>
      %43 = vector.broadcast %42 : vector<1x8x128xf32> to vector<4x8x128xf32>
      %44 = arith.mulf %35, %43 : vector<4x8x128xf32>
      %45 = vector.broadcast %30 : vector<1x8x128xi32> to vector<4x8x128xi32>
      %46 = arith.cmpi eq, %45, %12 : vector<4x8x128xi32>
      %c128_i32_23 = arith.constant 128 : i32
      %47 = arith.muli %23, %c128_i32_23 : i32
      %48 = arith.addi %19, %47 : i32
      %49 = vector.broadcast %48 : i32 to vector<1x8x128xi32>
      %50 = arith.addi %49, %17 : vector<1x8x128xi32>
      %c256_i32 = arith.constant 256 : i32
      %51 = vector.broadcast %c256_i32 : i32 to vector<1x8x128xi32>
      %52 = arith.cmpi slt, %50, %51 : vector<1x8x128xi32>
      %53 = vector.broadcast %52 : vector<1x8x128xi1> to vector<4x8x128xi1>
      %54 = arith.andi %46, %53 : vector<4x8x128xi1>
      %cst_24 = arith.constant 0.000000e+00 : f32
      %55 = vector.shape_cast %52 : vector<1x8x128xi1> to vector<1x8x128xi1>
      %56 = vector.broadcast %55 : vector<1x8x128xi1> to vector<4x8x128xi1>
      %57 = vector.broadcast %cst_24 : f32 to vector<4x8x128xf32>
      %58 = arith.select %56, %44, %57 : vector<4x8x128xi1>, vector<4x8x128xf32>
      %cst_25 = arith.constant 0.000000e+00 : f32
      %59 = vector.broadcast %cst_25 : f32 to vector<4x8x128xf32>
      %60 = arith.select %54, %44, %59 : vector<4x8x128xi1>, vector<4x8x128xf32>
      %cst_26 = arith.constant 1.000000e+00 : f32
      %cst_27 = arith.constant 0.000000e+00 : f32
      %61 = vector.broadcast %cst_26 : f32 to vector<4x8x128xf32>
      %62 = vector.broadcast %cst_27 : f32 to vector<4x8x128xf32>
      %63 = arith.select %54, %61, %62 : vector<4x8x128xi1>, vector<4x8x128xf32>
      %64 = arith.addf %58, %63 : vector<4x8x128xf32>
      %65 = arith.addf %20, %60 : vector<4x8x128xf32>
      %66 = arith.addf %21, %64 : vector<4x8x128xf32>
      %c1_i32 = arith.constant 1 : i32
      %c0_28 = arith.constant 0 : index
      %c0_29 = arith.constant 0 : index
      %c0_30 = arith.constant 0 : index
      %67 = vector.load %arg5[%c0_28, %c0_29, %c0_30] : memref<4x8x128xf32, #tpu.memory_space<vmem>>, vector<4x8x128xf32>
      tpu.vector_store %arg5[%c0_28, %c0_29, %c0_30], %65 {strides = array<i32>} : memref<4x8x128xf32, #tpu.memory_space<vmem>>, vector<4x8x128xf32>,
      %c0_31 = arith.constant 0 : index
      %c0_32 = arith.constant 0 : index
      %c0_33 = arith.constant 0 : index
      %68 = vector.load %arg6[%c0_31, %c0_32, %c0_33] : memref<4x8x128xf32, #tpu.memory_space<vmem>>, vector<4x8x128xf32>
      tpu.vector_store %arg6[%c0_31, %c0_32, %c0_33], %66 {strides = array<i32>} : memref<4x8x128xf32, #tpu.memory_space<vmem>>, vector<4x8x128xf32>,
    } else {
    }
    %c0_i32_5 = arith.constant 0 : i32
    %9 = arith.cmpi eq, %arg1, %c0_i32_5 : i32
    %10 = arith.extui %9 : i1 to i32
    %c0_i32_6 = arith.constant 0 : i32
    %11 = arith.cmpi ne, %10, %c0_i32_6 : i32
    scf.if %11 {
      %c0 = arith.constant 0 : index
      %c0_7 = arith.constant 0 : index
      %c0_8 = arith.constant 0 : index
      %12 = vector.load %arg5[%c0, %c0_7, %c0_8] : memref<4x8x128xf32, #tpu.memory_space<vmem>>, vector<4x8x128xf32>
      %cst = arith.constant dense<0.000000e+00> : vector<4x128xf32>
      %13 = vector.multi_reduction <add>, %12, %cst [1] : vector<4x8x128xf32> to vector<4x128xf32>
      %cst_9 = arith.constant dense<0.000000e+00> : vector<4xf32>
      %14 = vector.multi_reduction <add>, %13, %cst_9 [1] : vector<4x128xf32> to vector<4xf32>
      %15 = vector.shape_cast %14 : vector<4xf32> to vector<4x1xf32>
      %cst_10 = arith.constant 0.00999999977 : f32
      %16 = vector.broadcast %cst_10 : f32 to vector<4x1xf32>
      %17 = arith.addf %15, %16 : vector<4x1xf32>
      %c0_11 = arith.constant 0 : index
      %c0_12 = arith.constant 0 : index
      %c0_13 = arith.constant 0 : index
      %18 = vector.load %arg6[%c0_11, %c0_12, %c0_13] : memref<4x8x128xf32, #tpu.memory_space<vmem>>, vector<4x8x128xf32>
      %cst_14 = arith.constant dense<0.000000e+00> : vector<4x128xf32>
      %19 = vector.multi_reduction <add>, %18, %cst_14 [1] : vector<4x8x128xf32> to vector<4x128xf32>
      %cst_15 = arith.constant dense<0.000000e+00> : vector<4xf32>
      %20 = vector.multi_reduction <add>, %19, %cst_15 [1] : vector<4x128xf32> to vector<4xf32>
      %21 = vector.shape_cast %20 : vector<4xf32> to vector<4x1xf32>
      %cst_16 = arith.constant 0.00999999977 : f32
      %22 = vector.broadcast %cst_16 : f32 to vector<4x1xf32>
      %23 = arith.addf %21, %22 : vector<4x1xf32>
      %cst_17 = arith.constant 2.000000e+00 : f32
      %24 = vector.broadcast %cst_17 : f32 to vector<4x1xf32>
      %25 = arith.mulf %24, %17 : vector<4x1xf32>
      %26 = arith.divf %25, %23 : vector<4x1xf32>
      %c0_18 = arith.constant 0 : index
      %c0_19 = arith.constant 0 : index
      %c0_20 = arith.constant 0 : index
      %27 = vector.load %arg4[%c0_18, %c0_19, %c0_20] : memref<1x4x1xf32, #tpu.memory_space<vmem>>, vector<1x4x1xf32>
      %28 = vector.shape_cast %27 : vector<1x4x1xf32> to vector<4x1xf32>
      %29 = vector.shape_cast %26 : vector<4x1xf32> to vector<1x4x1xf32>
      tpu.vector_store %arg4[%c0_18, %c0_19, %c0_20], %29 {strides = array<i32>} : memref<1x4x1xf32, #tpu.memory_space<vmem>>, vector<1x4x1xf32>,
    } else {
    }
    return
  }
  func.func @transform_0(%arg0: i32, %arg1: i32) -> (i32, i32, i32, i32) {
    %c0_i32 = arith.constant 0 : i32
    %c0_i32_0 = arith.constant 0 : i32
    %c0_i32_1 = arith.constant 0 : i32
    return %arg0, %c0_i32, %arg1, %c0_i32_0 : i32, i32, i32, i32
  }
  func.func @transform_1(%arg0: i32, %arg1: i32) -> (i32, i32, i32, i32) {
    %c0_i32 = arith.constant 0 : i32
    %c0_i32_0 = arith.constant 0 : i32
    %c0_i32_1 = arith.constant 0 : i32
    return %arg0, %c0_i32, %arg1, %c0_i32_0 : i32, i32, i32, i32
  }
  func.func @transform_2(%arg0: i32, %arg1: i32) -> (i32, i32, i32) {
    %c0_i32 = arith.constant 0 : i32
    %c0_i32_0 = arith.constant 0 : i32
    %c0_i32_1 = arith.constant 0 : i32
    return %arg0, %c0_i32, %c0_i32_0 : i32, i32, i32
  }
}

</mosaic_0001>

<bundles_post_ra>
// kernel: tpu_custom_call.1
= control target key start
LH: loop header
LB: loop body
LE: loop exit
PB: predicated region body
PF: predicated region fallthrough
CT: control target
= control target key end

     0   :  { %7 = vsyncpa [#allocation5], 0  ;;  %s983_s0 = inlined_call_operand.hbm [shape: f32[2,4,8,128], index: 0, kind: input, shape index: {}]   ;;  %s984_s1 = inlined_call_operand.hbm [shape: s8[2,1,8,128], index: 1, kind: input, shape index: {}]   ;;  %s985_s2 = inlined_call_operand.vmem [shape: f32[2,4,1], index: 2, kind: output, shape index: {}]  }
   0x1   :  { %9 = vsyncpa [#allocation5 + $0x1], 0 }
   0x2   :  { %10 = vsyncpa [#allocation7], 0 }
   0x3   :  { %12 = vsyncpa [#allocation7 + $0x1], 0  ;;  %s832_s9 = smov 0   ;;  %s834_s10 = smov 0  }
   0x4   :  { %s836_s11 = smov 0   ;;  %s838_s12 = smov 0  }
   0x5   :  { %s840_s13 = smov 0   ;;  %s842_s14 = smov 0  }
   0x6 LB: > { %s607_s15 = sadd.s32 4294967295, %s812_s14   ;;  %s30_s16 = sadd.s32 1, %s808_s13  ;;  %s812_s14 = sphi %s842_s14, %s18_s14   ;;  %s808_s13 = sphi %s840_s13, %s1001_s13   ;;  %s804_s12 = sphi %s838_s12, %s1000_s12   ;;  %s800_s11 = sphi %s836_s11, %s999_s11   ;;  %s796_s10 = sphi %s834_s10, %s998_s10   ;;  %s792_s9 = sphi %s832_s9, %s997_s9  }
   0x7   : > { %p32_p0 = scmp.ge.s32.totalorder %s30_s16, 2  ;;  %s39_s17 = sadd.s32 1, %s800_s11 }
   0x8   : > { %p46_p1 = scmp.ne.s32.totalorder %s800_s11, %s796_s10  ;;  %p47_p2 = scmp.eq.s32.totalorder %s812_s14, 0 }
   0x9   : > { %s1003_s16 = smov (%p32_p0, %s30_s16), 0  ;;  %p52_p4 = scmp.ne.s32.totalorder %s796_s10, %s792_s9 }
   0xa   : > { %p868_p3 = por %p47_p2, %p46_p1  ;;  %s34_s19 = ssub.s32 %s808_s13, %s1003_s16 }
   0xb   : > { %p53_p5 = scmp.eq.s32.totalorder %s607_s15, 0  ;;  %p37_p6 = scmp.eq.s32.totalorder %s34_s19, 0 }
   0xc   : > { %p634_p8 = scmp.lt.s32.totalorder %s812_s14, 2  ;;  %s130_s22 = sand.u32 1, %s800_s11  }
   0xd   : > { %p875_p7 = por %p53_p5, %p52_p4  ;;  %s622_s23 = sshll.u32 %s808_s13, 5 }
   0xe   : > { %s881_s21 = scalar_select %p37_p6, %s800_s11, %s39_s17  }
   0xf   : > { %s611_s24 = sshll.u32 %s130_s22, 5  ;;  %s140_s27 = scalar_lea.hbm %s983_s0, %s622_s23 }
  0x10   : > { %s141_s28 = sshll.u32 %s140_s27, 4  ;;  %s134_s29 = scalar_lea.vmem [#allocation4], %s611_s24  ;;  %s142_s28 = int_to_ptr.hbm [resolvable:$true] %s141_s28 }
  0x11   : > { %s143_s30 = sshll.u32 %s134_s29, 4  ;;  %p890_p9 = pnand %p634_p8, %p868_p3  ;;  %s144_s30 = int_to_ptr.vmem [resolvable:$true] %s143_s30 }
  0x12   : > { %p616_p10 = scmp.ge.s32.totalorder %s812_s14, 1  ;;  %p171_p11 = scmp.lt.s32.totalorder %s812_s14, 3 }
  0x13   : > { %s131_s4 = scalar_lea.sflag [#allocation5], %s130_s22  ;;  %s814_s5 = smov 128  }
  0x14   : > { %s815_s6 = smov 8   ;;  %p172_p12 = pnand %p616_p10, %p171_p11 }
  0x15   : > { %630 = dma.hbm_to_vmem [thread:$0]  (!%p890_p9), %s142_s28, 512, %s144_s30, %s131_s4, %s814_s5, %s814_s5, %s815_s6  }
  0x16   : > { %s614_s7 = sshll.u32 %s130_s22, 1  ;;  %s615_s8 = sshll.u32 %s808_s13, 1 }
  0x17   : > { %s162_s17 = scalar_lea.hbm %s984_s1, %s615_s8  ;;  %s157_s19 = scalar_lea.vmem [#allocation6], %s614_s7 }
  0x18   : > { %s164_s18 = sshll.u32 %s162_s17, 4  ;;  %s166_s23 = sshll.u32 %s157_s19, 4  ;;  %s165_s18 = int_to_ptr.hbm [resolvable:$true] %s164_s18  ;;  %s167_s23 = int_to_ptr.vmem [resolvable:$true] %s166_s23 }
  0x19   : > { %s154_s24 = scalar_lea.sflag [#allocation7], %s130_s22  ;;  %175 = sbr.rel (%p172_p12) target bundleno = 230 (0xe6), region = 28 }
  0x1a   : > { %633 = dma.hbm_to_vmem [thread:$0]  (!%p890_p9), %s165_s18, 32, %s167_s23, %s154_s24  }
  0x1b   : > { %s177_s25 = sand.u32 (!%p172_p12), 1, %s796_s10  }
  0x1c   : > { %s617_s26 = sshll.u32 (!%p172_p12), %s177_s25, 5  ;;  %s178_s27 = scalar_lea.sflag (!%p172_p12), [#allocation5], %s177_s25 }
  0x1d   : > { %s181_s28 = scalar_lea.vmem (!%p172_p12), [#allocation4], %s617_s26 }
  0x1e   : > { %783 = dma.done.wait (%p875_p7), %s178_s27, 512  }
  0x1f   : > { %785 = vsyncadd (%p875_p7), %s178_s27, 4294966784  ;;  %s618_s29 = sshll.u32 %s177_s25, 1  ;;  %s188_s30 = scalar_lea.sflag [#allocation7], %s177_s25 }
  0x20   : > { %s909_s4 = scalar_lea.vmem [#allocation6], %s618_s29 }
  0x21   : > { %787 = dma.done.wait (%p875_p7), %s188_s30, 32  }
  0x22   : > { %789 = vsyncadd (%p875_p7), %s188_s30, 4294967264  ;;  %v327_v0 = vld [vmem:[%s181_s28] sm:$0xff]  ;;  %v328_v1 = vld [vmem:[%s181_s28 + $0x8] sm:$0xff]  ;;  %v312_v15 = vlaneseq  ;;  %v816_v37 = vmov 0.0   ;;  %vm438_vm9 = vcmask 1041409   ;;  %vm440_vm10 = vcmask 1042434  }
  0x23   : > { %v329_v2 = vld [vmem:[%s181_s28 + $0x10] sm:$0xff]  ;;  %v330_v3 = vld [vmem:[%s181_s28 + $0x18] sm:$0xff]  ;;  %v333_v4 = vmax.f32 %v327_v0, %v328_v1  ;;  %v331_v24 = vld [vmem:[%s909_s4] sm:$0x3]  ;;  %vm442_vm11 = vcmask 1043459   ;;  %vm445_vm12 = vcmask 1043456  }
  0x24   : > { %v334_v5 = vmax.f32 %v329_v2, %v330_v3  ;;  %v313_v16 = vshrl.u32 %v312_v15, 7  ;;  %v315_v22 = vand.u32 127, %v312_v15  ;;  %v332_v28 = vunpack.c.0.s8 %v331_v24  ;;  %p217_p13 = scmp.lt.s32.totalorder %s804_s12, 1 }
  0x26   : > { %v335_v6 = vmax.f32 %v333_v4, %v334_v5  ;;  %v316_v23 = vmul.u32 128, %v313_v16  ;;  %vm359_vm0 = vcmp.eq.s32.totalorder %v332_v28, 0  ;;  %vm360_vm2 = vcmp.eq.s32.totalorder %v332_v28, 1  ;;  %s1005_s12 = smov (!%p217_p13, %s804_s12), 1 }
  0x27   : > { %vm361_vm3 = vcmp.eq.s32.totalorder %v332_v28, 2  ;;  %vm362_vm4 = vcmp.eq.s32.totalorder %v332_v28, 3  ;;  %s619_s20 = sshll.u32 %s1005_s12, 2 }
  0x28   : > { %v336_v7 = vsub.f32 %v327_v0, %v335_v6  ;;  %v337_v8 = vsub.f32 %v328_v1, %v335_v6  ;;  %v338_v9 = vsub.f32 %v329_v2, %v335_v6  ;;  %v339_v10 = vsub.f32 %v330_v3, %v335_v6  ;;  %s220_s5 = scalar_lea.vmem %s985_s2, %s619_s20 }
  0x29   : > { %v317_v27 = vadd.s32 %v316_v23, %v315_v22 }
  0x2a   : > { %v340_v11 = vmul.f32 1.442695, %v336_v7  ;;  %v342_v12 = vmul.f32 1.442695, %v337_v8  ;;  %v344_v13 = vmul.f32 1.442695, %v338_v9 }
  0x2b   : > { %v346_v14 = vmul.f32 1.442695, %v339_v10  ;;  %vm367_vm1 = vcmp.lt.s32.totalorder %v317_v27, 256 }
  0x2c   : > { %686 = vpow2.f32 %v340_v11  ;;  %vm917_vm5 = vmand %vm359_vm0, %vm367_vm1 }
  0x2d   : > { %688 = vpow2.f32 %v342_v12  ;;  %vm922_vm6 = vmand %vm360_vm2, %vm367_vm1  ;;  %v382_v38 = vsel %vm917_vm5, 1.0, %v816_v37 }
  0x2e   : > { %690 = vpow2.f32 %v344_v13  ;;  %vm927_vm7 = vmand %vm361_vm3, %vm367_vm1  ;;  %v383_v39 = vsel %vm922_vm6, 1.0, %v816_v37 }
  0x2f   : > { %692 = vpow2.f32 %v346_v14  ;;  %vm932_vm8 = vmand %vm362_vm4, %vm367_vm1  ;;  %v384_v40 = vsel %vm927_vm7, 1.0, %v816_v37 }
  0x30   : > { %v385_v41 = vsel %vm932_vm8, 1.0, %v816_v37 }
  0x32   : > { %v687_v17 = vpop.eup %686 }
  0x33   : > { %v689_v18 = vpop.eup %688 }
  0x34   : > { %v691_v19 = vpop.eup %690  ;;  %v348_v20 = vadd.f32 %v689_v18, %v687_v17 }
  0x35   : > { %v693_v21 = vpop.eup %692 }
  0x36   : > { %v349_v25 = vadd.f32 %v691_v19, %v348_v20 }
  0x38   : > { %v350_v26 = vadd.f32 %v693_v21, %v349_v25 }
  0x3a   : > { %694 = vrcp.f32 %v350_v26 }
  0x40   : > { %v695_v29 = vpop.eup %694 }
  0x41   : > { %v352_v31 = vmul.f32 %v695_v29, %v350_v26 }
  0x43   : > { %v353_v34 = vsub.f32 2.0, %v352_v31 }
  0x45   : > { %v354_v36 = vmul.f32 %v695_v29, %v353_v34 }
  0x47   : > { %v355_v42 = vmul.f32 %v687_v17, %v354_v36  ;;  %v356_v43 = vmul.f32 %v689_v18, %v354_v36  ;;  %v357_v44 = vmul.f32 %v691_v19, %v354_v36  ;;  %v358_v45 = vmul.f32 %v693_v21, %v354_v36 }
  0x49   : > { %v374_v46 = vsel %vm367_vm1, %v355_v42, 0.0  ;;  %v375_v47 = vsel %vm367_vm1, %v356_v43, 0.0  ;;  %v376_v48 = vsel %vm367_vm1, %v357_v44, 0.0  ;;  %v377_v49 = vsel %vm367_vm1, %v358_v45, 0.0 }
  0x4a   : > { %v386_v50 = vadd.f32 %v382_v38, %v374_v46  ;;  %v387_v51 = vadd.f32 %v383_v39, %v375_v47  ;;  %v388_v52 = vadd.f32 %v384_v40, %v376_v48  ;;  %v389_v53 = vadd.f32 %v385_v41, %v377_v49 }
  0x4b   : > { %v378_v54 = vsel %vm917_vm5, %v355_v42, 0.0  ;;  %v379_v55 = vsel %vm922_vm6, %v356_v43, 0.0  ;;  %v380_v56 = vsel %vm927_vm7, %v357_v44, 0.0  ;;  %v381_v57 = vsel %vm932_vm8, %v358_v45, 0.0 }
  0x4c   : > { %v454_v58 = vrot.slane %v386_v50, 4  ;;  %v460_v59 = vrot.slane %v387_v51, 4  ;;  %v466_v60 = vrot.slane %v388_v52, 4  ;;  %v472_v61 = vrot.slane %v389_v53, 4 }
  0x4d   : > { %v410_v62 = vrot.slane %v378_v54, 4  ;;  %v416_v63 = vrot.slane %v379_v55, 4  ;;  %v422_v0 = vrot.slane %v380_v56, 4  ;;  %v428_v1 = vrot.slane %v381_v57, 4 }
  0x4e   : > { %v455_v2 = vadd.f32 %v454_v58, %v386_v50  ;;  %v461_v3 = vadd.f32 %v460_v59, %v387_v51  ;;  %v467_v4 = vadd.f32 %v466_v60, %v388_v52  ;;  %v473_v5 = vadd.f32 %v472_v61, %v389_v53 }
  0x4f   : > { %v411_v6 = vadd.f32 %v410_v62, %v378_v54  ;;  %v417_v7 = vadd.f32 %v416_v63, %v379_v55  ;;  %v423_v8 = vadd.f32 %v422_v0, %v380_v56  ;;  %v429_v9 = vadd.f32 %v428_v1, %v381_v57 }
  0x50   : > { %v456_v10 = vrot.slane %v455_v2, 2  ;;  %v462_v11 = vrot.slane %v461_v3, 2  ;;  %v468_v12 = vrot.slane %v467_v4, 2  ;;  %v474_v13 = vrot.slane %v473_v5, 2 }
  0x51   : > { %v412_v14 = vrot.slane %v411_v6, 2  ;;  %v418_v15 = vrot.slane %v417_v7, 2  ;;  %v424_v16 = vrot.slane %v423_v8, 2  ;;  %v430_v17 = vrot.slane %v429_v9, 2 }
  0x52   : > { %v457_v18 = vadd.f32 %v456_v10, %v455_v2  ;;  %v463_v19 = vadd.f32 %v462_v11, %v461_v3  ;;  %v469_v20 = vadd.f32 %v468_v12, %v467_v4  ;;  %v475_v21 = vadd.f32 %v474_v13, %v473_v5 }
  0x53   : > { %v413_v22 = vadd.f32 %v412_v14, %v411_v6  ;;  %v419_v23 = vadd.f32 %v418_v15, %v417_v7  ;;  %v425_v24 = vadd.f32 %v424_v16, %v423_v8  ;;  %v431_v25 = vadd.f32 %v430_v17, %v429_v9 }
  0x54   : > { %v458_v26 = vrot.slane %v457_v18, 1  ;;  %v464_v27 = vrot.slane %v463_v19, 1  ;;  %v470_v28 = vrot.slane %v469_v20, 1  ;;  %v476_v29 = vrot.slane %v475_v21, 1 }
  0x55   : > { %v414_v30 = vrot.slane %v413_v22, 1  ;;  %v420_v31 = vrot.slane %v419_v23, 1  ;;  %v426_v32 = vrot.slane %v425_v24, 1  ;;  %v432_v33 = vrot.slane %v431_v25, 1 }
  0x56   : > { %v459_v34 = vadd.f32 %v458_v26, %v457_v18  ;;  %v465_v35 = vadd.f32 %v464_v27, %v463_v19  ;;  %v471_v36 = vadd.f32 %v470_v28, %v469_v20  ;;  %v477_v37 = vadd.f32 %v476_v29, %v475_v21 }
  0x57   : > { %v415_v38 = vadd.f32 %v414_v30, %v413_v22  ;;  %v421_v39 = vadd.f32 %v420_v31, %v419_v23  ;;  %v427_v40 = vadd.f32 %v426_v32, %v425_v24  ;;  %v433_v45 = vadd.f32 %v432_v33, %v431_v25 }
  0x58   : > { %v482_v41 = vsel %vm438_vm9, %v465_v35, %v459_v34  ;;  %vm506_vm1 = vcmask 3072  }
  0x59   : > { %v483_v42 = vsel %vm440_vm10, %v471_v36, %v482_v41  ;;  %v439_v43 = vsel %vm438_vm9, %v421_v39, %v415_v38 }
  0x5a   : > { %v484_v44 = vsel %vm442_vm11, %v477_v37, %v483_v42  ;;  %v441_v47 = vsel %vm440_vm10, %v427_v40, %v439_v43 }
  0x5b   : > { %v486_v46 = vsel %vm445_vm12, %v484_v44, 0.0  ;;  %v443_v48 = vsel %vm442_vm11, %v433_v45, %v441_v47 }
  0x5c   : > { %487 = vadd.xlane.f32.xlu0 %v486_v46  ;;  %v446_v49 = vsel %vm445_vm12, %v443_v48, 0.0 }
  0x64   : > { %447 = vadd.xlane.f32.xlu0 %v446_v49 }
  0xcf   : > { %v488_v50 = vpop.xlane.xlu0 %487 }
  0xd0   : > { %v489_v51 = vadd.f32 0.01, %v488_v50 }
  0xd2   : > { %696 = vrcp.f32 %v489_v51  ;;  %v502_v57 = vand.u32 2147483648, %v489_v51  ;;  %v500_v59 = vand.u32 2147483647, %v489_v51  ;;  %vm496_vm14 = vweird.f32 %v489_v51 }
  0xd4   : > { %v503_v62 = vor.u32 1.1754944e-38, %v502_v57  ;;  %vm501_vm0 = vcmp.eq.f32.partialorder %v500_v59, 8.507059e+37 }
  0xd7   : > { %v448_v53 = vpop.xlane.xlu0 %447 }
  0xd8   : > { %v697_v52 = vpop.eup %696  ;;  %v449_v56 = vadd.f32 0.01, %v448_v53 }
  0xd9   : > { %v492_v54 = vmul.f32 %v697_v52, %v489_v51  ;;  %vm497_vm13 = vweird.f32 %v697_v52 }
  0xda   : > { %v490_v61 = vmul.f32 2.0, %v449_v56  ;;  %vm498_vm15 = vmor %vm496_vm14, %vm497_vm13 }
  0xdb   : > { %v493_v55 = vsub.f32 1.0, %v492_v54 }
  0xdd   : > { %v494_v58 = vmul.f32 %v697_v52, %v493_v55 }
  0xdf   : > { %v495_v60 = vadd.f32 %v697_v52, %v494_v58 }
  0xe1   : > { %v499_v63 = vsel %vm498_vm15, %v697_v52, %v495_v60 }
  0xe2   : > { %v504_v0 = vsel %vm501_vm0, %v503_v62, %v499_v63 }
  0xe3   : > { %v505_v1 = vmul.f32 %v504_v0, %v490_v61 }
  0xe5   : > { %507 = vst.msk [vmem:[%s220_s5] sm:$0xf] %vm506_vm1, %v505_v1 }
  0xe6 PF: > { %s18_s14 = sadd.s32 1, %s812_s14   ;;  %s997_s9 = smov %s796_s10 }
  0xe7   : > { %p15_p0 = scmp.ge.s32.totalorder %s18_s14, 4   ;;  %s998_s10 = smov %s800_s11 }
  0xe8   : > { %s999_s11 = smov %s881_s21  ;;  %s1000_s12 = smov %s808_s13 }
  0xe9   : > { %s1001_s13 = smov %s1003_s16  ;;  %17 = sbr.rel (!%p15_p0) target bundleno = 6 (0x6), region = 93 }
  0xee   :  { %527 = vsyncpa [#allocation5], 1 }
  0xef   :  { %529 = vsyncpa [#allocation5 + $0x1], 1 }
  0xf0   :  { %530 = vsyncpa [#allocation7], 1 }
  0xf1   :  { %532 = vsyncpa [#allocation7 + $0x1], 1 }

</bundles_post_ra>
